<compile_context>
chip_gen: v5e
topology: v5e:2x2
jax: 0.10.0
libtpu: 0.0.40
codegen_flags: <defaults>
</compile_context>

<pallas_src>
import functools

import jax
import jax.numpy as jnp
from jax.experimental import pallas as pl
from jax.experimental.pallas import tpu as pltpu


def _msd_kernel(x_ref, w_ref, b_ref, o_ref, *, nb, C, H, W, d):
    # x_ref: (nb*C, H*W)   unpadded input, channels (+batch) packed along sublanes (VMEM)
    # w_ref: (nb*C, 9)     conv weights, batch-replicated (VMEM)
    # b_ref: (1,)          bias (SMEM scalar)
    # o_ref: (nb, H*W)     output (VMEM, lane-dense store)
    HW = H * W
    HP = H + 2 * d
    LPr = HP * W                             # row-padded image, flattened
    LP = ((LPr + 127) // 128) * 128          # lane-pad to whole 128-lane vregs
    S = nb * C

    x = x_ref[...]                           # (S, HW) f32

    # ---- fused reflect pad along H: rows d..1 | 0..H-1 | H-2..H-1-d  (+ zero lane pad) ----
    top = [x[:, r * W:(r + 1) * W] for r in range(d, 0, -1)]
    bot = [x[:, r * W:(r + 1) * W] for r in range(H - 2, H - 2 - d, -1)]
    pieces = top + [x] + bot
    if LP > LPr:
        pieces.append(jnp.zeros((S, LP - LPr), x.dtype))
    xr = jnp.concatenate(pieces, axis=1)     # (S, LP)

    # ---- memoized XLU lane rotations of xr (shared by kj slabs and border fix-ups) ----
    cache = {}

    def xroll(s):                            # xroll(s)[:, p] == xr[:, (p - s) % LP]
        s = s % LP
        if s == 0:
            return xr
        if s not in cache:
            cache[s] = pltpu.roll(xr, s, axis=1)
        return cache[s]

    # ---- hoisted column index + reflect border fix-ups (built once per grid step) ----
    col = jax.lax.broadcasted_iota(jnp.int32, (1, LP), 1) % W

    # kj=0: column j-d, reflected to d-j       for j <  d
    s0 = xroll(d)
    for j in range(d):
        s0 = jnp.where(col == j, xroll(-(d - 2 * j)), s0)
    # kj=1: column j
    s1 = xr
    # kj=2: column j+d, reflected to 2W-2-d-j  for j >= W-d
    s2 = xroll(-d)
    for j in range(W - d, W):
        s2 = jnp.where(col == j, xroll(-(2 * W - 2 - d - 2 * j)), s2)
    slabs = (s0, s1, s2)

    # ---- 9 dilated taps: (S,1) weight column (lane broadcast) x (S,LP) slab FMA.
    #      The ki row offset (±d*W lanes) is an XLU roll of the per-row partial sum, so the
    #      VALU only sees lane-dense multiply/adds; a single slice crops the valid window.
    w = w_ref[...]                           # (S, 9) f32
    acc = None
    for ki in range(3):
        row = None
        for kj in range(3):
            t = ki * 3 + kj
            term = w[:, t:t + 1] * slabs[kj]
            row = term if row is None else row + term
        shift = (1 - ki) * d * W
        if shift != 0:
            row = pltpu.roll(row, shift % LP, axis=1)
        acc = row if acc is None else acc + row

    # ---- crop valid window, reduce over channels (XLU cross-sublane), bias + ReLU ----
    acc = acc[:, d * W: d * W + HW]                        # (S, HW)
    y = jnp.sum(acc.reshape(nb, C, HW), axis=1)            # (nb, HW)
    o_ref[...] = jnp.maximum(y + b_ref[0], 0.0).astype(o_ref.dtype)


def msd_base_forward(x, weight, bias, dilation, *, batch_block=1):
    """x: (N, C, H, W) f32; weight: (1, C, 3, 3); bias: (1,). Returns (N, 1, H, W)."""
    n, c, h, w = x.shape
    d = int(dilation)
    if not (1 <= d < h and d < w):
        raise ValueError("reflect pad requires 1 <= dilation < H and < W")
    nb = batch_block                         # keep n // nb >= 2 so v7x's 2 TCs both get work
    assert n % nb == 0, "batch_block must divide N"
    hw = h * w

    # Free metadata reshapes: fold per-block batch into the (sublane) channel dim.
    x_flat = x.reshape(n // nb, nb * c, hw).astype(jnp.float32)
    w_vmem = jnp.tile(weight.reshape(c, 9).astype(jnp.float32), (nb, 1))  # (nb*C, 9)
    b_sm = bias.reshape(1).astype(jnp.float32)                            # (1,) SMEM scalar

    kernel = functools.partial(_msd_kernel, nb=nb, C=c, H=h, W=w, d=d)

    out = pl.pallas_call(
        kernel,
        out_shape=jax.ShapeDtypeStruct((n // nb, nb, hw), x.dtype),
        grid_spec=pltpu.PrefetchScalarGridSpec(
            num_scalar_prefetch=0,
            grid=(n // nb,),
            in_specs=[
                pl.BlockSpec((None, nb * c, hw), lambda i: (i, 0, 0)),   # input tile
                pl.BlockSpec((nb * c, 9), lambda i: (0, 0)),             # weights (VMEM)
                pl.BlockSpec(memory_space=pltpu.MemorySpace.SMEM),       # bias (SMEM)
            ],
            out_specs=pl.BlockSpec((None, nb, hw), lambda i: (i, 0, 0)),
        ),
        compiler_params=pltpu.CompilerParams(
            dimension_semantics=("parallel",),
            vmem_limit_bytes=32 * 1024 * 1024,   # above v5e's 16 MiB scoped default
        ),
    )(x_flat, w_vmem, b_sm)

    return out.reshape(n, 1, h, w)


def _reference(x, weight, bias, dilation):
    # Pure-elementwise f32 reference (reflect pad -> dilated 3x3 conv, 1 out channel -> ReLU).
    d = dilation
    xp = jnp.pad(x, ((0, 0), (0, 0), (d, d), (d, d)), mode="reflect")
    _, _, H, W = x.shape
    y = None
    for ki in range(3):
        for kj in range(3):
            patch = xp[:, :, ki * d:ki * d + H, kj * d:kj * d + W]        # (N,C,H,W)
            wk = weight[0, :, ki, kj][None, :, None, None]                # (1,C,1,1)
            term = jnp.sum(patch * wk, axis=1, keepdims=True)             # (N,1,H,W)
            y = term if y is None else y + term
    return jnp.maximum(y + bias.reshape(1, -1, 1, 1), 0.0)


if __name__ == "__main__":
    N, C, H, W = 2, 4, 16, 16
    DILATION = 2

    key = jax.random.PRNGKey(0)
    kx, kw, kb = jax.random.split(key, 3)

    x = jax.random.normal(kx, (N, C, H, W), dtype=jnp.float32)
    # Deterministic "Kaiming-ish" init for Conv2d(C, 1, 3, dilation=DILATION).
    fan_in = C * 3 * 3
    bound = 1.0 / (fan_in ** 0.5)
    weight = jax.random.uniform(kw, (1, C, 3, 3), jnp.float32, -bound, bound)
    bias = jax.random.uniform(kb, (1,), jnp.float32, -bound, bound)

    out = msd_base_forward(x, weight, bias, DILATION)
    out = jax.block_until_ready(out)

    ref = _reference(x, weight, bias, DILATION)
    assert out.shape == (N, 1, H, W)
    assert jnp.allclose(out, ref, atol=1e-5, rtol=1e-5)

    print("KERNEL_OK")
</pallas_src>

<mosaic_0001>
module attributes {stable_mosaic.version = 11 : i64} {
  func.func @_msd_kernel(%arg0: i32, %arg1: memref<1x4x256xf32, #tpu.memory_space<vmem>>, %arg2: memref<4x9xf32, #tpu.memory_space<vmem>>, %arg3: memref<1xf32, #tpu.memory_space<smem>>, %arg4: memref<1x1x256xf32, #tpu.memory_space<vmem>>) attributes {dimension_semantics = [#tpu.dimension_semantics<parallel>], iteration_bounds = array<i64: 2>, scalar_prefetch = 0 : i64, scratch_operands = 0 : i64, tpu.core_type = #tpu.core_type<tc>, window_params = [{transform_indices = @transform_0, window_bounds = array<i64: 1, 4, 256>}, {pipeline_mode = #tpu.pipeline_mode<synchronous>, transform_indices = @transform_1, window_bounds = array<i64: 4, 9>}, {transform_indices = @transform_2, window_bounds = array<i64: 1>}, {transform_indices = @transform_3, window_bounds = array<i64: 1, 1, 256>}]} {
    %c0 = arith.constant 0 : index
    %c0_0 = arith.constant 0 : index
    %c0_1 = arith.constant 0 : index
    %0 = vector.load %arg1[%c0, %c0_0, %c0_1] : memref<1x4x256xf32, #tpu.memory_space<vmem>>, vector<1x4x256xf32>
    %1 = vector.shape_cast %0 : vector<1x4x256xf32> to vector<4x256xf32>
    %2 = vector.extract_strided_slice %1 {offsets = [0, 32], sizes = [4, 16], strides = [1, 1]} : vector<4x256xf32> to vector<4x16xf32>
    %3 = vector.extract_strided_slice %1 {offsets = [0, 16], sizes = [4, 16], strides = [1, 1]} : vector<4x256xf32> to vector<4x16xf32>
    %4 = vector.extract_strided_slice %1 {offsets = [0, 224], sizes = [4, 16], strides = [1, 1]} : vector<4x256xf32> to vector<4x16xf32>
    %5 = vector.extract_strided_slice %1 {offsets = [0, 208], sizes = [4, 16], strides = [1, 1]} : vector<4x256xf32> to vector<4x16xf32>
    %cst = arith.constant 0.000000e+00 : f32
    %6 = vector.broadcast %cst : f32 to vector<4x64xf32>
    %7 = tpu.concatenate %2, %3, %1, %4, %5, %6 in 1 : vector<4x16xf32>, vector<4x16xf32>, vector<4x256xf32>, vector<4x16xf32>, vector<4x16xf32>, vector<4x64xf32> -> vector<4x384xf32>
    %8 = tpu.iota {dimensions = array<i32: 1>} : vector<1x384xi32>
    %c16_i32 = arith.constant 16 : i32
    %c0_i32 = arith.constant 0 : i32
    %9 = arith.cmpi eq, %c16_i32, %c0_i32 : i32
    %c1_i32 = arith.constant 1 : i32
    %10 = arith.select %9, %c1_i32, %c16_i32 : i32
    %11 = vector.broadcast %10 : i32 to vector<1x384xi32>
    %12 = arith.remsi %8, %11 : vector<1x384xi32>
    %c0_i32_2 = arith.constant 0 : i32
    %13 = vector.broadcast %c0_i32_2 : i32 to vector<1x384xi32>
    %14 = arith.cmpi ne, %12, %13 : vector<1x384xi32>
    %c0_i32_3 = arith.constant 0 : i32
    %15 = vector.broadcast %c0_i32_3 : i32 to vector<1x384xi32>
    %16 = arith.cmpi slt, %12, %15 : vector<1x384xi32>
    %c0_i32_4 = arith.constant 0 : i32
    %17 = arith.cmpi slt, %10, %c0_i32_4 : i32
    %18 = vector.broadcast %17 : i1 to vector<1x384xi1>
    %19 = vector.broadcast %18 : vector<1x384xi1> to vector<1x384xi1>
    %20 = arith.xori %16, %19 : vector<1x384xi1>
    %21 = arith.andi %20, %14 : vector<1x384xi1>
    %22 = vector.broadcast %10 : i32 to vector<1x384xi32>
    %23 = arith.addi %12, %22 : vector<1x384xi32>
    %24 = arith.select %21, %23, %12 : vector<1x384xi1>, vector<1x384xi32>
    %c2_i32 = arith.constant 2 : i32
    %25 = tpu.dynamic_rotate %7 by %c2_i32 dim 1 : vector<4x384xf32>, i32 -> vector<4x384xf32>
    %c0_i32_5 = arith.constant 0 : i32
    %26 = vector.broadcast %c0_i32_5 : i32 to vector<1x384xi32>
    %27 = arith.cmpi eq, %24, %26 : vector<1x384xi32>
    %c382_i32 = arith.constant 382 : i32
    %28 = tpu.dynamic_rotate %7 by %c382_i32 dim 1 : vector<4x384xf32>, i32 -> vector<4x384xf32>
    %29 = vector.shape_cast %27 : vector<1x384xi1> to vector<1x384xi1>
    %30 = vector.broadcast %29 : vector<1x384xi1> to vector<4x384xi1>
    %31 = arith.select %30, %28, %25 : vector<4x384xi1>, vector<4x384xf32>
    %c1_i32_6 = arith.constant 1 : i32
    %32 = vector.broadcast %c1_i32_6 : i32 to vector<1x384xi32>
    %33 = arith.cmpi eq, %24, %32 : vector<1x384xi32>
    %34 = vector.shape_cast %33 : vector<1x384xi1> to vector<1x384xi1>
    %35 = vector.broadcast %34 : vector<1x384xi1> to vector<4x384xi1>
    %36 = arith.select %35, %7, %31 : vector<4x384xi1>, vector<4x384xf32>
    %c14_i32 = arith.constant 14 : i32
    %37 = vector.broadcast %c14_i32 : i32 to vector<1x384xi32>
    %38 = arith.cmpi eq, %24, %37 : vector<1x384xi32>
    %39 = vector.shape_cast %38 : vector<1x384xi1> to vector<1x384xi1>
    %40 = vector.broadcast %39 : vector<1x384xi1> to vector<4x384xi1>
    %41 = arith.select %40, %7, %28 : vector<4x384xi1>, vector<4x384xf32>
    %c15_i32 = arith.constant 15 : i32
    %42 = vector.broadcast %c15_i32 : i32 to vector<1x384xi32>
    %43 = arith.cmpi eq, %24, %42 : vector<1x384xi32>
    %44 = vector.shape_cast %43 : vector<1x384xi1> to vector<1x384xi1>
    %45 = vector.broadcast %44 : vector<1x384xi1> to vector<4x384xi1>
    %46 = arith.select %45, %25, %41 : vector<4x384xi1>, vector<4x384xf32>
    %c0_7 = arith.constant 0 : index
    %c0_8 = arith.constant 0 : index
    %47 = vector.load %arg2[%c0_7, %c0_8] : memref<4x9xf32, #tpu.memory_space<vmem>>, vector<4x9xf32>
    %48 = vector.extract_strided_slice %47 {offsets = [0, 0], sizes = [4, 1], strides = [1, 1]} : vector<4x9xf32> to vector<4x1xf32>
    %49 = vector.broadcast %48 : vector<4x1xf32> to vector<4x384xf32>
    %50 = arith.mulf %49, %36 : vector<4x384xf32>
    %51 = vector.extract_strided_slice %47 {offsets = [0, 1], sizes = [4, 1], strides = [1, 1]} : vector<4x9xf32> to vector<4x1xf32>
    %52 = vector.broadcast %51 : vector<4x1xf32> to vector<4x384xf32>
    %53 = arith.mulf %52, %7 : vector<4x384xf32>
    %54 = arith.addf %50, %53 : vector<4x384xf32>
    %55 = vector.extract_strided_slice %47 {offsets = [0, 2], sizes = [4, 1], strides = [1, 1]} : vector<4x9xf32> to vector<4x1xf32>
    %56 = vector.broadcast %55 : vector<4x1xf32> to vector<4x384xf32>
    %57 = arith.mulf %56, %46 : vector<4x384xf32>
    %58 = arith.addf %54, %57 : vector<4x384xf32>
    %c32_i32 = arith.constant 32 : i32
    %59 = tpu.dynamic_rotate %58 by %c32_i32 dim 1 : vector<4x384xf32>, i32 -> vector<4x384xf32>
    %60 = vector.extract_strided_slice %47 {offsets = [0, 3], sizes = [4, 1], strides = [1, 1]} : vector<4x9xf32> to vector<4x1xf32>
    %61 = vector.broadcast %60 : vector<4x1xf32> to vector<4x384xf32>
    %62 = arith.mulf %61, %36 : vector<4x384xf32>
    %63 = vector.extract_strided_slice %47 {offsets = [0, 4], sizes = [4, 1], strides = [1, 1]} : vector<4x9xf32> to vector<4x1xf32>
    %64 = vector.broadcast %63 : vector<4x1xf32> to vector<4x384xf32>
    %65 = arith.mulf %64, %7 : vector<4x384xf32>
    %66 = arith.addf %62, %65 : vector<4x384xf32>
    %67 = vector.extract_strided_slice %47 {offsets = [0, 5], sizes = [4, 1], strides = [1, 1]} : vector<4x9xf32> to vector<4x1xf32>
    %68 = vector.broadcast %67 : vector<4x1xf32> to vector<4x384xf32>
    %69 = arith.mulf %68, %46 : vector<4x384xf32>
    %70 = arith.addf %66, %69 : vector<4x384xf32>
    %71 = arith.addf %59, %70 : vector<4x384xf32>
    %72 = vector.extract_strided_slice %47 {offsets = [0, 6], sizes = [4, 1], strides = [1, 1]} : vector<4x9xf32> to vector<4x1xf32>
    %73 = vector.broadcast %72 : vector<4x1xf32> to vector<4x384xf32>
    %74 = arith.mulf %73, %36 : vector<4x384xf32>
    %75 = vector.extract_strided_slice %47 {offsets = [0, 7], sizes = [4, 1], strides = [1, 1]} : vector<4x9xf32> to vector<4x1xf32>
    %76 = vector.broadcast %75 : vector<4x1xf32> to vector<4x384xf32>
    %77 = arith.mulf %76, %7 : vector<4x384xf32>
    %78 = arith.addf %74, %77 : vector<4x384xf32>
    %79 = vector.extract_strided_slice %47 {offsets = [0, 8], sizes = [4, 1], strides = [1, 1]} : vector<4x9xf32> to vector<4x1xf32>
    %80 = vector.broadcast %79 : vector<4x1xf32> to vector<4x384xf32>
    %81 = arith.mulf %80, %46 : vector<4x384xf32>
    %82 = arith.addf %78, %81 : vector<4x384xf32>
    %c352_i32 = arith.constant 352 : i32
    %83 = tpu.dynamic_rotate %82 by %c352_i32 dim 1 : vector<4x384xf32>, i32 -> vector<4x384xf32>
    %84 = arith.addf %71, %83 : vector<4x384xf32>
    %85 = vector.extract_strided_slice %84 {offsets = [0, 32], sizes = [4, 256], strides = [1, 1]} : vector<4x384xf32> to vector<4x256xf32>
    %86 = vector.shape_cast %85 : vector<4x256xf32> to vector<1x4x256xf32>
    %cst_9 = arith.constant dense<0.000000e+00> : vector<1x256xf32>
    %87 = vector.multi_reduction <add>, %86, %cst_9 [1] : vector<1x4x256xf32> to vector<1x256xf32>
    %c0_10 = arith.constant 0 : index
    %88 = memref.load %arg3[%c0_10] : memref<1xf32, #tpu.memory_space<smem>>
    %89 = vector.broadcast %88 : f32 to vector<1x256xf32>
    %90 = arith.addf %87, %89 : vector<1x256xf32>
    %cst_11 = arith.constant 0.000000e+00 : f32
    %91 = vector.broadcast %cst_11 : f32 to vector<1x256xf32>
    %92 = arith.maximumf %90, %91 : vector<1x256xf32>
    %c0_12 = arith.constant 0 : index
    %c0_13 = arith.constant 0 : index
    %c0_14 = arith.constant 0 : index
    %93 = vector.load %arg4[%c0_12, %c0_13, %c0_14] : memref<1x1x256xf32, #tpu.memory_space<vmem>>, vector<1x1x256xf32>
    %94 = vector.shape_cast %93 : vector<1x1x256xf32> to vector<1x256xf32>
    %95 = vector.shape_cast %92 : vector<1x256xf32> to vector<1x1x256xf32>
    tpu.vector_store %arg4[%c0_12, %c0_13, %c0_14], %95 {strides = array<i32>} : memref<1x1x256xf32, #tpu.memory_space<vmem>>, vector<1x1x256xf32>,
    return
  }
  func.func @transform_0(%arg0: i32) -> (i32, i32, i32) {
    %c0_i32 = arith.constant 0 : i32
    %c0_i32_0 = arith.constant 0 : i32
    %c0_i32_1 = arith.constant 0 : i32
    return %arg0, %c0_i32, %c0_i32_0 : i32, i32, i32
  }
  func.func @transform_1(%arg0: i32) -> (i32, i32) {
    %c0_i32 = arith.constant 0 : i32
    %c0_i32_0 = arith.constant 0 : i32
    %c0_i32_1 = arith.constant 0 : i32
    return %c0_i32, %c0_i32_0 : i32, i32
  }
  func.func @transform_2(%arg0: i32) -> i32 {
    %c0_i32 = arith.constant 0 : i32
    %c0_i32_0 = arith.constant 0 : i32
    return %c0_i32 : i32
  }
  func.func @transform_3(%arg0: i32) -> (i32, i32, i32) {
    %c0_i32 = arith.constant 0 : i32
    %c0_i32_0 = arith.constant 0 : i32
    %c0_i32_1 = arith.constant 0 : i32
    return %arg0, %c0_i32, %c0_i32_0 : i32, i32, i32
  }
}

</mosaic_0001>

<bundles_post_ra>
// kernel: tpu_custom_call.1
= control target key start
LH: loop header
LB: loop body
LE: loop exit
PB: predicated region body
PF: predicated region fallthrough
CT: control target
= control target key end

     0   :  { %s1091_s0 = inlined_call_operand.hbm [shape: f32[2,4,256], index: 0, kind: input, shape index: {}]   ;;  %s1092_s1 = inlined_call_operand.hbm [shape: f32[4,9], index: 1, kind: input, shape index: {}]   ;;  %s1093_s2 = inlined_call_operand.<no memory space> [shape: f32[1], index: 2, kind: input, shape index: {}]   ;;  %s1094_s3 = inlined_call_operand.hbm [shape: f32[2,1,256], index: 3, kind: output, shape index: {}]  }
   0x1   :  { %8 = sst [smem:[#allocation2]] %s1093_s2 }
   0x2   :  { %9 = vsyncpa [#allocation4], 0 }
   0x3   :  { %11 = vsyncpa [#allocation4 + $0x1], 0 }
   0x4   :  { %12 = vsyncpa [#allocation7], 0 }
   0x5   :  { %13 = vsyncpa [#allocation5], 0 }
   0x6   :  { %15 = vsyncpa [#allocation5 + $0x1], 0  ;;  %s874_s14 = smov 0   ;;  %s876_s15 = smov 0  }
   0x7   :  { %s878_s16 = smov 0   ;;  %s880_s17 = smov 0  }
   0x8 LB: > { %s895_s2 = sadd.s32 4294967295, %s834_s17   ;;  %s607_s18 = sadd.s32 4294967294, %s834_s17   ;;  %s834_s17 = sphi %s880_s17, %s1104_s17   ;;  %s830_s16 = sphi %s878_s16, %s1103_s16   ;;  %s826_s15 = sphi %s876_s15, %s1102_s15   ;;  %s822_s14 = sphi %s874_s14, %s1101_s14  }
   0x9   : > { %p41_p0 = scmp.ne.s32.totalorder %s826_s15, %s822_s14  ;;  %p42_p1 = scmp.eq.s32.totalorder %s895_s2, 0 }
   0xa   : > { %p107_p2 = scmp.eq.s32.totalorder %s895_s2, 1  ;;  %p113_p3 = scmp.eq.s32.totalorder %s607_s18, 1 }
   0xb   : > { %p904_p4 = por %p42_p1, %p41_p0  ;;  %p608_p5 = scmp.ge.s32.totalorder %s834_s17, 1 }
   0xc   : > { %p909_p6 = por %p113_p3, %p41_p0  ;;  %p120_p7 = scmp.lt.s32.totalorder %s834_s17, 3 }
   0xd   : > { %s132_s23 = sshll.u32 %s1092_s1, 4  ;;  %s836_s25 = smov [#allocation6]   ;;  %s133_s23 = int_to_ptr.hbm [resolvable:$true] %s132_s23 }
   0xe   : > { %p917_p8 = pnand %p608_p5, %p120_p7  ;;  %s134_s26 = sshll.u32 %s836_s25, 4  ;;  %s135_s26 = int_to_ptr.vmem [resolvable:$true] %s134_s26 }
   0xf   : > { %s927_s27 = sadd.s32 1, %s834_s17   ;;  %s28_s28 = sadd.s32 1, %s830_s16 }
  0x10   : > { %p631_p10 = pneg %p917_p8  ;;  %s25_s29 = ssub.s32 %s834_s17, %s927_s27 }
  0x11   : > { %p26_p12 = scmp.eq.s32.totalorder %s25_s29, 0  ;;  %p35_p13 = scmp.ne.s32.totalorder %s830_s16, %s826_s15 }
  0x12   : > { %p632_p11 = pnand %p631_p10, %p42_p1  ;;  %p36_p0 = scmp.eq.s32.totalorder %s834_s17, 0 }
  0x13   : > { %s936_s30 = scalar_select %p26_p12, %s830_s16, %s28_s28  }
  0x14   : > { %634 = dma.hbm_to_vmem [thread:$0]  (!%p632_p11), %s133_s23, 64, %s135_s26, [#allocation7]  }
  0x15   : > { %p940_p3 = por %p107_p2, %p35_p13  ;;  %p644_p5 = scmp.lt.s32.totalorder %s834_s17, 2 }
  0x16   : > { %s148_s5 = sand.u32 1, %s830_s16   ;;  %s622_s6 = sshll.u32 %s834_s17, 3 }
  0x17   : > { %p37_p7 = por %p36_p0, %p35_p13  ;;  %s611_s7 = sshll.u32 %s148_s5, 3 }
  0x18   : > { %s157_s10 = scalar_lea.hbm %s1091_s0, %s622_s6  ;;  %s152_s12 = scalar_lea.vmem [#allocation3], %s611_s7 }
  0x19   : > { %s159_s11 = sshll.u32 %s157_s10, 4  ;;  %s161_s13 = sshll.u32 %s152_s12, 4  ;;  %s160_s11 = int_to_ptr.hbm [resolvable:$true] %s159_s11  ;;  %s162_s13 = int_to_ptr.vmem [resolvable:$true] %s161_s13 }
  0x1a   : > { %p950_p10 = pnand %p644_p5, %p37_p7  ;;  %s149_s21 = scalar_lea.sflag [#allocation4], %s148_s5 }
  0x1b   : > { %s734_s22 = sshra.s32 %s160_s11, 4  ;;  %s741_s28 = scalar_lea.hbm %s1091_s0, 16  ;;  %s735_s22 = int_to_ptr.hbm [resolvable:$true] %s734_s22 }
  0x1c   : > { %s736_s23 = scalar_lea.hbm %s735_s22, 8  ;;  %p738_p11 = pneg %p950_p10 }
  0x1d   : > { %p737_p2 = scmp.ne.s32.totalorder %s735_s22, %s736_s23  ;;  %p742_p0 = scmp.lt.s32.totalorder %s735_s22, %s1091_s0 }
  0x1e   : > { %p743_p5 = scmp.lt.s32.totalorder %s741_s28, %s736_s23 }
  0x1f   : > { %p739_p12 = pnand %p738_p11, %p737_p2 }
  0x20   : > { %p744_p7 = por %p743_p5, %p742_p0 }
  0x21   : > { %p740_p13 = pneg %p739_p12 }
  0x23   : > { %p745_p9 = pnand %p744_p7, %p740_p13 }
  0x25   : > { %748 = shalt.err (!%p745_p9)
}
  0x26   : > { %638 = dma.hbm_to_vmem [thread:$0]  (!%p950_p10), %s160_s11, 128, %s162_s13, %s149_s21  }
  0x27   : > { %170 = sbr.rel (%p917_p8) target bundleno = 596 (0x254), region = 32  ;;  %s967_s5 = sand.u32 (!%p917_p8), 1, %s826_s15  }
  0x28   : > { %s615_s7 = sshll.u32 (!%p917_p8), %s967_s5, 3  ;;  %s173_s8 = scalar_lea.sflag (!%p917_p8), [#allocation4], %s967_s5 }
  0x29   : > { %s176_s9 = scalar_lea.vmem (!%p917_p8), [#allocation3], %s615_s7 }
  0x2c   : > { %809 = dma.done.wait (%p904_p4), %s173_s8, 128  }
  0x2d   : > { %811 = vsyncadd (%p904_p4), %s173_s8, 4294967168 }
  0x2e   : > { %813 = dma.done.wait (%p42_p1), [#allocation7], 64  }
  0x2f   : > { %815 = vsyncadd (%p42_p1), [#allocation7], 4294967232  ;;  %v205_v0 = vld [vmem:[%s176_s9] sm:$0xff]  ;;  %v837_v1 = vmov 0   ;;  %s838_s24 = smov 96   ;;  %s839_s10 = smov 32   ;;  %v242_v30 = vlaneseq }
  0x30   : > { %207 = vst [vmem:[#allocation1] ss:$2 sm:$0xff] %v205_v0  ;;  %694 = vset.pattern.permute.xlu2 %v837_v1  ;;  %v350_v5 = vld [vmem:[#allocation6] sm:$0xf]  ;;  %s840_s19 = smov 64   ;;  %v841_v8 = vmov 2  }
  0x31   : > { %696 = vset.pattern.permute.xlu1 %v841_v8  ;;  %v842_v9 = vmov 1   ;;  %v843_v10 = vmov 6   ;;  %vm234_vm0 = vcmask 130048   ;;  %vm219_vm1 = vcmask 261120   ;;  %s844_s11 = smov 2   ;;  %s846_s12 = smov 126  }
  0x32   : > { %695 = vset.pattern.permute.xlu0 %v842_v9  ;;  %v845_v15 = vmov 7   ;;  %vm238_vm2 = vcmask 392192   ;;  %vm240_vm3 = vcmask 523264   ;;  %v847_v23 = vmov 8   ;;  %s483_s13 = sld [smem:[#allocation2]]  ;;  %s617_s18 = sshll.u32 %s967_s5, 1 }
  0x33   : > { %v848_v24 = vmov 3   ;;  %v849_v25 = vmov 5   ;;  %v850_v26 = vmov 4   ;;  %v999_v33 = vand.u32 127, %v242_v30  ;;  %s619_s21 = sshll.u32 %s895_s2, 1  ;;  %s204_s26 = scalar_lea.vmem [#allocation8], %s617_s18 }
  0x34   : > { %s522_s25 = scalar_lea.hbm %s1094_s3, %s619_s21  ;;  %s524_s28 = sshll.u32 %s204_s26, 4  ;;  %s525_s28 = int_to_ptr.vmem [resolvable:$true] %s524_s28 }
  0x35   : > { %v250_v34 = vand.u32 15, %v999_v33  ;;  %vm301_vm4 = vcmp.lt.s32.totalorder %v999_v33, 126  ;;  %v244_v36 = vadd.s32 128, %v999_v33  ;;  %v245_v38 = vadd.s32 256, %v999_v33  ;;  %s526_s29 = sshll.u32 %s522_s25, 4  ;;  %s512_s6 = scalar_lea.sflag [#allocation5], %s967_s5  ;;  %s527_s29 = int_to_ptr.hbm [resolvable:$true] %s526_s29 }
  0x36   : > { %vm288_vm7 = vcmp.lt.s32.totalorder %v999_v33, 2  ;;  %s778_s7 = sshra.s32 %s527_s29, 4  ;;  %s779_s7 = int_to_ptr.hbm [resolvable:$true] %s778_s7 }
  0x37   : > { %v208_v2 = vld.sshfl [vmem:[#allocation1] sm:$0xff pattern:$0x75316420]  ;;  %vm326_vm5 = vcmp.eq.s32.totalorder %v250_v34, 14  ;;  %vm292_vm6 = vcmp.eq.s32.totalorder %v250_v34, 0  ;;  %vm338_vm8 = vcmp.eq.s32.totalorder %v250_v34, 15  ;;  %p785_p9 = scmp.lt.s32.totalorder %s779_s7, %s1094_s3 }
  0x38   : > { %209 = vrot.lane.b32.xlu1 %v208_v2, %s838_s24  ;;  %212 = vst [vmem:[#allocation1] ss:$2 sm:$0xff] %v205_v0  ;;  %vm314_vm9 = vcmp.eq.s32.totalorder %v250_v34, 1  ;;  %v257_v44 = vand.u32 15, %v244_v36  ;;  %v264_v47 = vand.u32 15, %v245_v38  ;;  %s780_s2 = scalar_lea.hbm %s779_s7, 2 }
  0x39   : > { %p781_p1 = scmp.ne.s32.totalorder %s779_s7, %s780_s2 }
  0x3a   : > { %vm293_vm10 = vcmp.eq.s32.totalorder %v257_v44, 0  ;;  %vm294_vm11 = vcmp.eq.s32.totalorder %v264_v47, 0  ;;  %vm315_vm12 = vcmp.eq.s32.totalorder %v257_v44, 1  ;;  %vm327_vm13 = vcmp.eq.s32.totalorder %v257_v44, 14 }
  0x3b   : > { %vm328_vm14 = vcmp.eq.s32.totalorder %v264_v47, 14  ;;  %vm316_vm15 = vcmp.eq.s32.totalorder %v264_v47, 1  ;;  %p782_p4 = pnand %p781_p1, %p940_p3 }
  0x3d   : > { %p783_p8 = pneg %p782_p4 }
  0x3f   : > { %v214_v3 = vld.sshfl [vmem:[#allocation1 + $0x8] sm:$0xff pattern:$0x75316420]  ;;  %v213_v4 = vld.sshfl [vmem:[#allocation1] sm:$0xff pattern:$0x75316420] }
  0x40   : > { %217 = vrot.lane.b32.xlu0 %v214_v3, %s839_s10  ;;  %224 = vst [vmem:[#allocation1] ss:$2 sm:$0xff] %v205_v0  ;;  %215 = vrot.lane.b32.xlu2 %v213_v4, %s839_s10 }
  0x47   : > { %v225_v6 = vld.sshfl [vmem:[#allocation1 + $0x8] sm:$0xff pattern:$0x75316420] }
  0x48   : > { %226 = vrot.lane.b32.xlu0 %v225_v6, %s840_s19  ;;  %229 = vst [vmem:[#allocation1] ss:$2 sm:$0xff] %v205_v0  ;;  %353 = vperm.xlu2 %694, %v350_v5  }
  0x4f   : > { %v230_v7 = vld.sshfl [vmem:[#allocation1 + $0x8] sm:$0xff pattern:$0x75316420] }
  0x50   : > { %231 = vrot.lane.b32.xlu1 %v230_v7, %s838_s24  ;;  %697 = vset.pattern.permute.xlu2 %v843_v10 }
  0x58   : > { %370 = vperm.xlu1 %696, %v350_v5  }
  0x60   : > { %698 = vset.pattern.permute.xlu1 %v845_v15 }
  0x9a   : > { %v216_v11 = vpop.permute.xlu2 %215 }
  0xa2   : > { %v354_v27 = vpop.permute.xlu2 %353 }
  0xaa   : > { %v210_v12 = vpop.permute.xlu1 %209 }
  0xab   : > { %v235_v13 = vsel %vm234_vm0, %v210_v12, %v205_v0  ;;  %vm339_vm0 = vcmp.eq.s32.totalorder %v257_v44, 15 }
  0xac   : > { %v984_v14 = vsel %vm219_vm1, %v235_v13, %v216_v11 }
  0xad   : > { %282 = vrot.lane.b32.xlu2 %v984_v14, %s844_s11 }
  0xb2   : > { %v218_v16 = vpop.permute.xlu0 %217 }
  0xb3   : > { %v988_v17 = vsel %vm219_vm1, %v216_v11, %v218_v16 }
  0xb4   : > { %284 = vrot.lane.b32.xlu0 %v988_v17, %s844_s11 }
  0xb5   : > { %295 = vrot.lane.b32.xlu2 %v984_v14, %s846_s12 }
  0xba   : > { %v227_v18 = vpop.permute.xlu0 %226 }
  0xbb   : > { %v237_v19 = vsel %vm219_vm1, %v218_v16, %v227_v18  ;;  %vm340_vm1 = vcmp.eq.s32.totalorder %v264_v47, 15 }
  0xbc   : > { %297 = vrot.lane.b32.xlu0 %v988_v17, %s846_s12 }
  0xbd   : > { %420 = vperm.xlu2 %697, %v350_v5  }
  0xc2   : > { %v232_v20 = vpop.permute.xlu1 %231 }
  0xc3   : > { %v239_v21 = vsel %vm238_vm2, %v237_v19, %v232_v20  ;;  %vm385_vm2 = vcmp.lt.s32.totalorder %v999_v33, 32 }
  0xc4   : > { %v994_v22 = vsel %vm240_vm3, %v239_v21, 0.0  ;;  %360 = vperm.xlu0 %695, %v350_v5   ;;  %vm452_vm3 = vcmp.lt.s32.totalorder %v999_v33, 96  ;;  %v484_v33 = vstv %s483_s13 }
  0xc5   : > { %286 = vrot.lane.b32.xlu1 %v994_v22, %s844_s11  ;;  %699 = vset.pattern.permute.xlu2 %v847_v23 }
  0xc6   : > { %437 = vperm.xlu2 %699, %v350_v5  }
  0xca   : > { %v371_v31 = vpop.permute.xlu1 %370 }
  0xcc   : > { %700 = vset.pattern.permute.xlu0 %v848_v24 }
  0xcd   : > { %390 = vperm.xlu0 %700, %v350_v5   ;;  %299 = vrot.lane.b32.xlu1 %v994_v22, %s846_s12 }
  0xce   : > { %702 = vset.pattern.permute.xlu2 %v849_v25 }
  0xcf   : > { %407 = vperm.xlu2 %702, %v350_v5  }
  0xd5   : > { %427 = vperm.xlu1 %698, %v350_v5   ;;  %703 = vset.pattern.permute.xlu0 %v847_v23 }
  0xdd   : > { %701 = vset.pattern.permute.xlu1 %v850_v26 }
  0xde   : > { %397 = vperm.xlu1 %701, %v350_v5  }
 0x107   : > { %v283_v29 = vpop.permute.xlu2 %282 }
 0x10f   : > { %v296_v35 = vpop.permute.xlu2 %295 }
 0x117   : > { %v421_v48 = vpop.permute.xlu2 %420 }
 0x120   : > { %v438_v7 = vpop.permute.xlu2 %437 }
 0x126   : > { %v285_v28 = vpop.permute.xlu0 %284 }
 0x127   : > { %v290_v55 = vsel %vm288_vm7, %v283_v29, %v285_v28 }
 0x129   : > { %v408_v34 = vpop.permute.xlu2 %407 }
 0x12e   : > { %v298_v32 = vpop.permute.xlu0 %297 }
 0x12f   : > { %v303_v37 = vsel %vm301_vm4, %v296_v35, %v298_v32 }
 0x130   : > { %v335_v42 = vsel %vm326_vm5, %v984_v14, %v303_v37  ;;  %vm459_vm5 = vcmask 1043712  }
 0x136   : > { %v361_v40 = vpop.permute.xlu0 %360 }
 0x137   : > { %v287_v39 = vpop.permute.xlu1 %286  ;;  %v363_v49 = vmul.f32 %v361_v40, %v984_v14  ;;  %v365_v2 = vmul.f32 %v361_v40, %v994_v22  ;;  %v364_v5 = vmul.f32 %v361_v40, %v988_v17 }
 0x138   : > { %v291_v41 = vsel %vm288_vm7, %v287_v39, %v283_v29  ;;  %v289_v56 = vsel %vm288_vm7, %v285_v28, %v287_v39  ;;  %vm496_vm7 = vcmask 1040384  }
 0x139   : > { %v311_v43 = vsel %vm292_vm6, %v303_v37, %v291_v41  ;;  %v1011_v45 = vsel %vm338_vm8, %v291_v41, %v335_v42  ;;  %vm475_vm6 = vcmask 257024   ;;  %vm498_vm8 = vcmask 1041408  }
 0x13a   : > { %v323_v46 = vsel %vm314_vm9, %v984_v14, %v311_v43  ;;  %v373_v52 = vmul.f32 %v371_v31, %v1011_v45  ;;  %v410_v44 = vmul.f32 %v408_v34, %v1011_v45  ;;  %vm503_vm9 = vcmask 785408  }
 0x13b   : > { %v356_v50 = vmul.f32 %v354_v27, %v323_v46  ;;  %v423_v21 = vmul.f32 %v421_v48, %v323_v46 }
 0x13d   : > { %v366_v51 = vadd.f32 %v363_v49, %v356_v50 }
 0x13f   : > { %v300_v53 = vpop.permute.xlu1 %299  ;;  %v376_v54 = vadd.f32 %v373_v52, %v366_v51  ;;  %v391_v29 = vpop.permute.xlu0 %390 }
 0x140   : > { %v302_v57 = vsel %vm301_vm4, %v298_v32, %v300_v53  ;;  %v304_v58 = vsel %vm301_vm4, %v300_v53, %v296_v35  ;;  %v393_v36 = vmul.f32 %v391_v29, %v323_v46  ;;  %vm467_vm4 = vcmask 1043456  }
 0x141   : > { %v312_v59 = vsel %vm293_vm10, %v302_v57, %v290_v55  ;;  %v313_v60 = vsel %vm294_vm11, %v304_v58, %v289_v56  ;;  %v336_v61 = vsel %vm327_vm13, %v988_v17, %v302_v57  ;;  %v337_v62 = vsel %vm328_vm14, %v994_v22, %v304_v58  ;;  %379 = vrot.lane.b32.xlu1 %v376_v54, %s839_s10 }
 0x142   : > { %v324_v63 = vsel %vm315_vm12, %v988_v17, %v312_v59  ;;  %v325_v0 = vsel %vm316_vm15, %v994_v22, %v313_v60  ;;  %v349_v1 = vsel %vm340_vm1, %v289_v56, %v337_v62  ;;  %v348_v3 = vsel %vm339_vm0, %v290_v55, %v336_v61 }
 0x143   : > { %v358_v4 = vmul.f32 %v354_v27, %v325_v0  ;;  %v357_v6 = vmul.f32 %v354_v27, %v324_v63  ;;  %v375_v9 = vmul.f32 %v371_v31, %v349_v1  ;;  %v374_v11 = vmul.f32 %v371_v31, %v348_v3 }
 0x144   : > { %v424_v12 = vmul.f32 %v421_v48, %v324_v63  ;;  %v425_v23 = vmul.f32 %v421_v48, %v325_v0  ;;  %v441_v25 = vmul.f32 %v438_v7, %v348_v3  ;;  %v440_v31 = vmul.f32 %v438_v7, %v1011_v45 }
 0x145   : > { %v368_v8 = vadd.f32 %v365_v2, %v358_v4  ;;  %v367_v10 = vadd.f32 %v364_v5, %v357_v6  ;;  %v442_v32 = vmul.f32 %v438_v7, %v349_v1  ;;  %v394_v37 = vmul.f32 %v391_v29, %v324_v63 }
 0x146   : > { %v395_v40 = vmul.f32 %v391_v29, %v325_v0  ;;  %v411_v47 = vmul.f32 %v408_v34, %v348_v3  ;;  %v412_v50 = vmul.f32 %v408_v34, %v349_v1  ;;  %vm508_vm10 = vcmp.lt.s32.totalorder %v242_v30, 256 }
 0x147   : > { %v428_v13 = vpop.permute.xlu1 %427  ;;  %v378_v15 = vadd.f32 %v375_v9, %v368_v8  ;;  %v377_v20 = vadd.f32 %v374_v11, %v367_v10 }
 0x148   : > { %v430_v16 = vmul.f32 %v428_v13, %v984_v14  ;;  %v431_v18 = vmul.f32 %v428_v13, %v988_v17  ;;  %v432_v19 = vmul.f32 %v428_v13, %v994_v22 }
 0x149   : > { %383 = vrot.lane.b32.xlu0 %v378_v15, %s839_s10  ;;  %381 = vrot.lane.b32.xlu2 %v377_v20, %s839_s10 }
 0x14a   : > { %v434_v24 = vadd.f32 %v431_v18, %v424_v12  ;;  %v433_v26 = vadd.f32 %v430_v16, %v423_v21  ;;  %v435_v27 = vadd.f32 %v432_v19, %v425_v23 }
 0x14c   : > { %v444_v28 = vadd.f32 %v441_v25, %v434_v24  ;;  %v443_v35 = vadd.f32 %v440_v31, %v433_v26  ;;  %v445_v39 = vadd.f32 %v442_v32, %v435_v27 }
 0x14e   : > { %448 = vrot.lane.b32.xlu1 %v444_v28, %s838_s24 }
 0x150   : > { %v398_v38 = vpop.permute.xlu1 %397 }
 0x151   : > { %v400_v41 = vmul.f32 %v398_v38, %v984_v14  ;;  %v401_v42 = vmul.f32 %v398_v38, %v988_v17  ;;  %v402_v43 = vmul.f32 %v398_v38, %v994_v22  ;;  %446 = vrot.lane.b32.xlu0 %v443_v35, %s838_s24  ;;  %450 = vrot.lane.b32.xlu2 %v445_v39, %s838_s24 }
 0x153   : > { %v403_v48 = vadd.f32 %v400_v41, %v393_v36  ;;  %v404_v49 = vadd.f32 %v401_v42, %v394_v37  ;;  %v405_v46 = vadd.f32 %v402_v43, %v395_v40 }
 0x155   : > { %v414_v51 = vadd.f32 %v411_v47, %v404_v49  ;;  %v413_v52 = vadd.f32 %v410_v44, %v403_v48  ;;  %v415_v53 = vadd.f32 %v412_v50, %v405_v46 }
 0x1a3   : > { %v382_v54 = vpop.permute.xlu2 %381 }
 0x1ab   : > { %v451_v55 = vpop.permute.xlu2 %450 }
 0x1b3   : > { %v380_v14 = vpop.permute.xlu1 %379 }
 0x1b4   : > { %v387_v22 = vsel %vm385_vm2, %v380_v14, %v382_v54 }
 0x1b5   : > { %v417_v45 = vadd.f32 %v414_v51, %v387_v22 }
 0x1bb   : > { %v384_v17 = vpop.permute.xlu0 %383 }
 0x1bc   : > { %v386_v56 = vsel %vm385_vm2, %v382_v54, %v384_v17  ;;  %v388_v57 = vsel %vm385_vm2, %v384_v17, %v380_v14 }
 0x1bd   : > { %v416_v61 = vadd.f32 %v413_v52, %v388_v57  ;;  %v418_v62 = vadd.f32 %v415_v53, %v386_v56 }
 0x1c0   : > { %v449_v58 = vpop.permute.xlu1 %448 }
 0x1c1   : > { %v453_v59 = vsel %vm452_vm3, %v449_v58, %v451_v55 }
 0x1c2   : > { %v457_v60 = vadd.f32 %v453_v59, %v417_v45 }
 0x1c3   : > { %v447_v63 = vpop.permute.xlu0 %446 }
 0x1c4   : > { %v468_v0 = vsel %vm467_vm4, %v457_v60, 0.0  ;;  %v454_v1 = vsel %vm452_vm3, %v447_v63, %v449_v58  ;;  %v455_v2 = vsel %vm452_vm3, %v451_v55, %v447_v63 }
 0x1c5   : > { %v469_v3 = vrot.slane %v468_v0, 4  ;;  %v456_v4 = vadd.f32 %v454_v1, %v416_v61  ;;  %v458_v5 = vadd.f32 %v455_v2, %v418_v62 }
 0x1c7   : > { %v470_v6 = vadd.f32 %v469_v3, %v468_v0  ;;  %v460_v7 = vsel %vm459_vm5, %v456_v4, 0.0  ;;  %v476_v8 = vsel %vm475_vm6, %v458_v5, 0.0 }
 0x1c8   : > { %v461_v9 = vrot.slane %v460_v7, 4  ;;  %v477_v10 = vrot.slane %v476_v8, 4 }
 0x1c9   : > { %v471_v11 = vrot.slane %v470_v6, 2 }
 0x1ca   : > { %v462_v12 = vadd.f32 %v461_v9, %v460_v7  ;;  %v478_v13 = vadd.f32 %v477_v10, %v476_v8 }
 0x1cb   : > { %v472_v15 = vadd.f32 %v471_v11, %v470_v6 }
 0x1cc   : > { %v463_v16 = vrot.slane %v462_v12, 2  ;;  %v479_v18 = vrot.slane %v478_v13, 2 }
 0x1cd   : > { %v473_v19 = vrot.slane %v472_v15, 1 }
 0x1ce   : > { %v464_v20 = vadd.f32 %v463_v16, %v462_v12  ;;  %v480_v21 = vadd.f32 %v479_v18, %v478_v13 }
 0x1cf   : > { %v474_v23 = vadd.f32 %v473_v19, %v472_v15 }
 0x1d0   : > { %v465_v24 = vrot.slane %v464_v20, 1  ;;  %v481_v25 = vrot.slane %v480_v21, 1 }
 0x1d1   : > { %v486_v26 = vadd.f32 %v484_v33, %v474_v23 }
 0x1d2   : > { %v466_v27 = vadd.f32 %v465_v24, %v464_v20  ;;  %v482_v28 = vadd.f32 %v481_v25, %v480_v21 }
 0x1d3   : > { %v489_v29 = vmax.f32 %v486_v26, 0.0 }
 0x1d4   : > { %v485_v31 = vadd.f32 %v484_v33, %v466_v27  ;;  %v487_v32 = vadd.f32 %v484_v33, %v482_v28 }
 0x1d5   : > { %v494_v34 = vrot.slane %v489_v29, 7 }
 0x1d6   : > { %v488_v35 = vmax.f32 %v485_v31, 0.0  ;;  %v490_v36 = vmax.f32 %v487_v32, 0.0 }
 0x1d8   : > { %v495_v37 = vrot.slane %v490_v36, 6  ;;  %v497_v38 = vsel %vm496_vm7, %v488_v35, %v494_v34 }
 0x1da   : > { %v499_v39 = vsel %vm498_vm8, %v497_v38, %v495_v37 }
 0x1db   : > { %500 = vrot.lane.b32.xlu1 %v499_v39, %s838_s24  ;;  %s784_s24 = scalar_lea.hbm %s1094_s3, 4 }
 0x1dc   : > { %p786_p10 = scmp.lt.s32.totalorder %s784_s24, %s780_s2 }
 0x1de   : > { %p787_p2 = por %p786_p10, %p785_p9 }
 0x1e0   : > { %p788_p11 = pnand %p787_p2, %p783_p8 }
 0x24d   : > { %v501_v40 = vpop.permute.xlu1 %500 }
 0x24e   : > { %v502_v41 = vrot.slane %v501_v40, 1 }
 0x250   : > { %v504_v42 = vsel %vm503_vm9, %v501_v40, %v502_v41 }
 0x251   : > { %510 = vst.msk [vmem:[%s204_s26] sm:$0x3] %vm508_vm10, %v504_v42 }
 0x252   : > { %791 = shalt.err (!%p788_p11)
}
 0x253   : > { %629 = dma.vmem_to_hbm [thread:$0]  (%p940_p3), %s525_s28, 32, %s527_s29, %s512_s6  }
 0x254 PF: > { %s538_s5 = sand.u32 1, %s822_s14   ;;  %p1100_p12 = scmp.ge.s32.totalorder %s834_s17, 2 }
 0x255   : > { %s539_s11 = scalar_lea.sflag [#allocation5], %s538_s5 }
 0x256   : > { %p640_p13 = pnand %p1100_p12, %p909_p6 }
 0x258   : > { %p641_p0 = pneg %p640_p13 }
 0x25a   : > { %817 = dma.done.wait (%p641_p0), %s539_s11, 32  }
 0x25b   : > { %819 = vsyncadd (%p641_p0), %s539_s11, 4294967264  ;;  %p18_p5 = scmp.ge.s32.totalorder %s927_s27, 4   ;;  %s1101_s14 = smov %s826_s15 }
 0x25c   : > { %s1102_s15 = smov %s830_s16  ;;  %s1103_s16 = smov %s936_s30 }
 0x25d   : > { %s1104_s17 = smov %s927_s27  ;;  %20 = sbr.rel (!%p18_p5) target bundleno = 8 (0x8), region = 81 }
 0x262   :  { %545 = vsyncpa [#allocation4], 1 }
 0x263   :  { %547 = vsyncpa [#allocation4 + $0x1], 1 }
 0x264   :  { %548 = vsyncpa [#allocation7], 1 }
 0x265   :  { %549 = vsyncpa [#allocation5], 1 }
 0x266   :  { %551 = vsyncpa [#allocation5 + $0x1], 1 }

</bundles_post_ra>
